<compile_context>
chip_gen: v5e
topology: v5e:2x2
jax: 0.10.0
libtpu: 0.0.40
codegen_flags: <defaults>
</compile_context>

<pallas_src>
import functools

import jax
import jax.numpy as jnp
from jax.experimental import pallas as pl
from jax.experimental.pallas import tpu as pltpu


def _trainer_kernel(idx_ref, table_ref, wt_ref, b_ref, out_ref, emb_ref, sem,
                    *, tb, n_classes):
    """One batch tile of `tb` rows.

    idx_ref   : [B_pad] int32 in SMEM (scalar-prefetched token ids)
    table_ref : [V, D]  f32 in HBM (pl.ANY) -- gathered row-by-row via DMA
    wt_ref    : [D, C_pad] f32 in VMEM (fc weight, transposed + lane-padded)
    b_ref     : [1, C_pad] f32 in VMEM (fc bias, lane-padded)
    out_ref   : [tb, C_pad] f32 in VMEM (log-probs, padded lanes are junk)
    emb_ref   : [tb, D] f32 VMEM scratch (gathered embedding rows)
    sem       : DMA semaphores, one per gathered row
    """
    base = pl.program_id(0) * tb

    # --- embedding lookup: gather `tb` rows HBM -> VMEM with async DMAs ---
    for r in range(tb):
        tok = idx_ref[base + r]
        pltpu.make_async_copy(
            table_ref.at[pl.ds(tok, 1), :],
            emb_ref.at[pl.ds(r, 1), :],
            sem.at[r],
        ).start()
    for r in range(tb):
        pltpu.make_async_copy(
            table_ref.at[pl.ds(0, 1), :],
            emb_ref.at[pl.ds(r, 1), :],
            sem.at[r],
        ).wait()

    emb = emb_ref[...]                                           # [tb, D] f32

    # --- fc: Linear(128, 10) (class dim padded to lane-dense 128) ---
    logits = jnp.dot(emb, wt_ref[...],
                     preferred_element_type=jnp.float32) + b_ref[...]  # [tb, C_pad]

    # Mask padded lanes so they cannot corrupt the softmax normalizer.
    lane = jax.lax.broadcasted_iota(jnp.int32, logits.shape, 1)
    logits = jnp.where(lane < n_classes, logits, jnp.float32(-1e30))

    # --- log_softmax over dim=1 (last dim), f32 math ---
    m = jnp.max(logits, axis=-1, keepdims=True)
    shifted = logits - m
    lse = jnp.log(jnp.sum(jnp.exp(shifted), axis=-1, keepdims=True))
    out_ref[...] = shifted - lse


def trainer_forward(indices, table, fc_w, fc_b, *, tb=8, c_pad=128):
    """indices: [B] int32, table: [V, D] f32, fc_w: [C, D], fc_b: [C] -> [B, C] log-probs."""
    B = indices.shape[0]
    V, D = table.shape
    C = fc_w.shape[0]
    assert c_pad >= C and c_pad % 128 == 0
    assert tb % 8 == 0  # f32 sublane alignment

    b_pad = pl.cdiv(B, tb) * tb

    # Clamp (torch nn.Embedding would raise on OOB; here we just stay in-bounds) and pad.
    idx = jnp.clip(indices.astype(jnp.int32), 0, V - 1)
    idx = jnp.pad(idx, (0, b_pad - B))

    # Lane-dense fc params: [D, C_pad] / [1, C_pad], zero-padded beyond C.
    wt = jnp.zeros((D, c_pad), jnp.float32).at[:, :C].set(fc_w.T.astype(jnp.float32))
    bias = jnp.zeros((1, c_pad), jnp.float32).at[:, :C].set(fc_b.astype(jnp.float32))

    kernel = functools.partial(_trainer_kernel, tb=tb, n_classes=C)

    out = pl.pallas_call(
        kernel,
        out_shape=jax.ShapeDtypeStruct((b_pad, c_pad), jnp.float32),
        grid_spec=pltpu.PrefetchScalarGridSpec(
            num_scalar_prefetch=1,              # indices -> SMEM
            grid=(b_pad // tb,),
            in_specs=[
                pl.BlockSpec(memory_space=pl.ANY),                # table stays in HBM
                pl.BlockSpec((D, c_pad), lambda i, idx: (0, 0)),  # fc weight (resident)
                pl.BlockSpec((1, c_pad), lambda i, idx: (0, 0)),  # fc bias (resident)
            ],
            out_specs=pl.BlockSpec((tb, c_pad), lambda i, idx: (i, 0)),
            scratch_shapes=[
                pltpu.VMEM((tb, D), jnp.float32),     # gathered embedding rows
                pltpu.SemaphoreType.DMA((tb,)),       # one DMA sem per row
            ],
        ),
        compiler_params=pltpu.CompilerParams(
            dimension_semantics=("parallel",)),       # batch tiles shard across TCs (v7x)
    )(idx, table.astype(jnp.float32), wt, bias)

    return out[:B, :C]


if __name__ == "__main__":
    B = 32         # batch
    V = 64         # vocab size of the (remote) embedding
    D = 128        # embedding dim == fc in_features
    C = 10         # fc out_features

    key = jax.random.PRNGKey(0)
    k_tab, k_w, k_b, k_idx = jax.random.split(key, 4)

    # Deterministic synthetic parameters (nn.Embedding(V,128) and nn.Linear(128,10)).
    table = jax.random.normal(k_tab, (V, D), dtype=jnp.float32)
    fc_w = jax.random.normal(k_w, (C, D), dtype=jnp.float32) * (1.0 / jnp.sqrt(D))
    fc_b = jax.random.normal(k_b, (C,), dtype=jnp.float32) * 0.01
    indices = jax.random.randint(k_idx, (B,), 0, V, dtype=jnp.int32)

    out = trainer_forward(indices, table, fc_w, fc_b)
    out = jax.block_until_ready(out)

    # Reference check in plain JAX.
    emb_ref = jnp.take(table, indices, axis=0)
    logits_ref = emb_ref @ fc_w.T + fc_b
    ref = jax.nn.log_softmax(logits_ref, axis=1)
    assert out.shape == (B, C)
    assert jnp.allclose(out, ref, atol=1e-5, rtol=1e-5)

    print("KERNEL_OK")
</pallas_src>

<mosaic_0001>
module attributes {stable_mosaic.version = 11 : i64} {
  func.func @_trainer_kernel(%arg0: i32, %arg1: memref<32xi32, #tpu.memory_space<smem>>, %arg2: memref<64x128xf32, #tpu.memory_space<any>>, %arg3: memref<128x128xf32, #tpu.memory_space<vmem>>, %arg4: memref<1x128xf32, #tpu.memory_space<vmem>>, %arg5: memref<8x128xf32, #tpu.memory_space<vmem>>, %arg6: memref<8x128xf32, #tpu.memory_space<vmem>>, %arg7: memref<8x!tpu.dma_semaphore, #tpu.memory_space<semaphore_mem>>) attributes {dimension_semantics = [#tpu.dimension_semantics<parallel>], iteration_bounds = array<i64: 4>, scalar_prefetch = 1 : i64, scratch_operands = 2 : i64, tpu.core_type = #tpu.core_type<tc>, window_params = [{}, {pipeline_mode = #tpu.pipeline_mode<synchronous>, transform_indices = @transform_1, window_bounds = array<i64: 128, 128>}, {pipeline_mode = #tpu.pipeline_mode<synchronous>, transform_indices = @transform_2, window_bounds = array<i64: 1, 128>}, {transform_indices = @transform_3, window_bounds = array<i64: 8, 128>}]} {
    %c8_i32 = arith.constant 8 : i32
    %0 = arith.muli %arg0, %c8_i32 : i32
    %c0_i32 = arith.constant 0 : i32
    %1 = arith.addi %0, %c0_i32 : i32
    %2 = arith.index_cast %1 : i32 to index
    %3 = memref.load %arg1[%2] : memref<32xi32, #tpu.memory_space<smem>>
    %c0_i32_0 = arith.constant 0 : i32
    %c0_i32_1 = arith.constant 0 : i32
    %4 = tpu.memref_slice %arg2[%3, %c0_i32_1] : memref<64x128xf32, #tpu.memory_space<any>> -> memref<1x128xf32, #tpu.memory_space<any>>
    %c0_i32_2 = arith.constant 0 : i32
    %c0_i32_3 = arith.constant 0 : i32
    %5 = tpu.memref_slice %arg6[%c0_i32_2, %c0_i32_3] : memref<8x128xf32, #tpu.memory_space<vmem>> -> memref<1x128xf32, #tpu.memory_space<vmem>>
    %6 = tpu.memref_slice %arg7[%c0_i32_0] : memref<8x!tpu.dma_semaphore, #tpu.memory_space<semaphore_mem>> -> memref<1x!tpu.dma_semaphore, #tpu.memory_space<semaphore_mem>>
    %7 = tpu.memref_squeeze %6 : memref<1x!tpu.dma_semaphore, #tpu.memory_space<semaphore_mem>> -> memref<!tpu.dma_semaphore, #tpu.memory_space<semaphore_mem>>
    tpu.enqueue_dma source(%4 : memref<1x128xf32, #tpu.memory_space<any>>) target(%5 : memref<1x128xf32, #tpu.memory_space<vmem>>) target_semaphore(%7 : memref<!tpu.dma_semaphore, #tpu.memory_space<semaphore_mem>>)
    %c1_i32 = arith.constant 1 : i32
    %8 = arith.addi %0, %c1_i32 : i32
    %9 = arith.index_cast %8 : i32 to index
    %10 = memref.load %arg1[%9] : memref<32xi32, #tpu.memory_space<smem>>
    %c1_i32_4 = arith.constant 1 : i32
    %c0_i32_5 = arith.constant 0 : i32
    %11 = tpu.memref_slice %arg2[%10, %c0_i32_5] : memref<64x128xf32, #tpu.memory_space<any>> -> memref<1x128xf32, #tpu.memory_space<any>>
    %c1_i32_6 = arith.constant 1 : i32
    %c0_i32_7 = arith.constant 0 : i32
    %12 = tpu.memref_slice %arg6[%c1_i32_6, %c0_i32_7] : memref<8x128xf32, #tpu.memory_space<vmem>> -> memref<1x128xf32, #tpu.memory_space<vmem>>
    %13 = tpu.memref_slice %arg7[%c1_i32_4] : memref<8x!tpu.dma_semaphore, #tpu.memory_space<semaphore_mem>> -> memref<1x!tpu.dma_semaphore, #tpu.memory_space<semaphore_mem>>
    %14 = tpu.memref_squeeze %13 : memref<1x!tpu.dma_semaphore, #tpu.memory_space<semaphore_mem>> -> memref<!tpu.dma_semaphore, #tpu.memory_space<semaphore_mem>>
    tpu.enqueue_dma source(%11 : memref<1x128xf32, #tpu.memory_space<any>>) target(%12 : memref<1x128xf32, #tpu.memory_space<vmem>>) target_semaphore(%14 : memref<!tpu.dma_semaphore, #tpu.memory_space<semaphore_mem>>)
    %c2_i32 = arith.constant 2 : i32
    %15 = arith.addi %0, %c2_i32 : i32
    %16 = arith.index_cast %15 : i32 to index
    %17 = memref.load %arg1[%16] : memref<32xi32, #tpu.memory_space<smem>>
    %c2_i32_8 = arith.constant 2 : i32
    %c0_i32_9 = arith.constant 0 : i32
    %18 = tpu.memref_slice %arg2[%17, %c0_i32_9] : memref<64x128xf32, #tpu.memory_space<any>> -> memref<1x128xf32, #tpu.memory_space<any>>
    %c2_i32_10 = arith.constant 2 : i32
    %c0_i32_11 = arith.constant 0 : i32
    %19 = tpu.memref_slice %arg6[%c2_i32_10, %c0_i32_11] : memref<8x128xf32, #tpu.memory_space<vmem>> -> memref<1x128xf32, #tpu.memory_space<vmem>>
    %20 = tpu.memref_slice %arg7[%c2_i32_8] : memref<8x!tpu.dma_semaphore, #tpu.memory_space<semaphore_mem>> -> memref<1x!tpu.dma_semaphore, #tpu.memory_space<semaphore_mem>>
    %21 = tpu.memref_squeeze %20 : memref<1x!tpu.dma_semaphore, #tpu.memory_space<semaphore_mem>> -> memref<!tpu.dma_semaphore, #tpu.memory_space<semaphore_mem>>
    tpu.enqueue_dma source(%18 : memref<1x128xf32, #tpu.memory_space<any>>) target(%19 : memref<1x128xf32, #tpu.memory_space<vmem>>) target_semaphore(%21 : memref<!tpu.dma_semaphore, #tpu.memory_space<semaphore_mem>>)
    %c3_i32 = arith.constant 3 : i32
    %22 = arith.addi %0, %c3_i32 : i32
    %23 = arith.index_cast %22 : i32 to index
    %24 = memref.load %arg1[%23] : memref<32xi32, #tpu.memory_space<smem>>
    %c3_i32_12 = arith.constant 3 : i32
    %c0_i32_13 = arith.constant 0 : i32
    %25 = tpu.memref_slice %arg2[%24, %c0_i32_13] : memref<64x128xf32, #tpu.memory_space<any>> -> memref<1x128xf32, #tpu.memory_space<any>>
    %c3_i32_14 = arith.constant 3 : i32
    %c0_i32_15 = arith.constant 0 : i32
    %26 = tpu.memref_slice %arg6[%c3_i32_14, %c0_i32_15] : memref<8x128xf32, #tpu.memory_space<vmem>> -> memref<1x128xf32, #tpu.memory_space<vmem>>
    %27 = tpu.memref_slice %arg7[%c3_i32_12] : memref<8x!tpu.dma_semaphore, #tpu.memory_space<semaphore_mem>> -> memref<1x!tpu.dma_semaphore, #tpu.memory_space<semaphore_mem>>
    %28 = tpu.memref_squeeze %27 : memref<1x!tpu.dma_semaphore, #tpu.memory_space<semaphore_mem>> -> memref<!tpu.dma_semaphore, #tpu.memory_space<semaphore_mem>>
    tpu.enqueue_dma source(%25 : memref<1x128xf32, #tpu.memory_space<any>>) target(%26 : memref<1x128xf32, #tpu.memory_space<vmem>>) target_semaphore(%28 : memref<!tpu.dma_semaphore, #tpu.memory_space<semaphore_mem>>)
    %c4_i32 = arith.constant 4 : i32
    %29 = arith.addi %0, %c4_i32 : i32
    %30 = arith.index_cast %29 : i32 to index
    %31 = memref.load %arg1[%30] : memref<32xi32, #tpu.memory_space<smem>>
    %c4_i32_16 = arith.constant 4 : i32
    %c0_i32_17 = arith.constant 0 : i32
    %32 = tpu.memref_slice %arg2[%31, %c0_i32_17] : memref<64x128xf32, #tpu.memory_space<any>> -> memref<1x128xf32, #tpu.memory_space<any>>
    %c4_i32_18 = arith.constant 4 : i32
    %c0_i32_19 = arith.constant 0 : i32
    %33 = tpu.memref_slice %arg6[%c4_i32_18, %c0_i32_19] : memref<8x128xf32, #tpu.memory_space<vmem>> -> memref<1x128xf32, #tpu.memory_space<vmem>>
    %34 = tpu.memref_slice %arg7[%c4_i32_16] : memref<8x!tpu.dma_semaphore, #tpu.memory_space<semaphore_mem>> -> memref<1x!tpu.dma_semaphore, #tpu.memory_space<semaphore_mem>>
    %35 = tpu.memref_squeeze %34 : memref<1x!tpu.dma_semaphore, #tpu.memory_space<semaphore_mem>> -> memref<!tpu.dma_semaphore, #tpu.memory_space<semaphore_mem>>
    tpu.enqueue_dma source(%32 : memref<1x128xf32, #tpu.memory_space<any>>) target(%33 : memref<1x128xf32, #tpu.memory_space<vmem>>) target_semaphore(%35 : memref<!tpu.dma_semaphore, #tpu.memory_space<semaphore_mem>>)
    %c5_i32 = arith.constant 5 : i32
    %36 = arith.addi %0, %c5_i32 : i32
    %37 = arith.index_cast %36 : i32 to index
    %38 = memref.load %arg1[%37] : memref<32xi32, #tpu.memory_space<smem>>
    %c5_i32_20 = arith.constant 5 : i32
    %c0_i32_21 = arith.constant 0 : i32
    %39 = tpu.memref_slice %arg2[%38, %c0_i32_21] : memref<64x128xf32, #tpu.memory_space<any>> -> memref<1x128xf32, #tpu.memory_space<any>>
    %c5_i32_22 = arith.constant 5 : i32
    %c0_i32_23 = arith.constant 0 : i32
    %40 = tpu.memref_slice %arg6[%c5_i32_22, %c0_i32_23] : memref<8x128xf32, #tpu.memory_space<vmem>> -> memref<1x128xf32, #tpu.memory_space<vmem>>
    %41 = tpu.memref_slice %arg7[%c5_i32_20] : memref<8x!tpu.dma_semaphore, #tpu.memory_space<semaphore_mem>> -> memref<1x!tpu.dma_semaphore, #tpu.memory_space<semaphore_mem>>
    %42 = tpu.memref_squeeze %41 : memref<1x!tpu.dma_semaphore, #tpu.memory_space<semaphore_mem>> -> memref<!tpu.dma_semaphore, #tpu.memory_space<semaphore_mem>>
    tpu.enqueue_dma source(%39 : memref<1x128xf32, #tpu.memory_space<any>>) target(%40 : memref<1x128xf32, #tpu.memory_space<vmem>>) target_semaphore(%42 : memref<!tpu.dma_semaphore, #tpu.memory_space<semaphore_mem>>)
    %c6_i32 = arith.constant 6 : i32
    %43 = arith.addi %0, %c6_i32 : i32
    %44 = arith.index_cast %43 : i32 to index
    %45 = memref.load %arg1[%44] : memref<32xi32, #tpu.memory_space<smem>>
    %c6_i32_24 = arith.constant 6 : i32
    %c0_i32_25 = arith.constant 0 : i32
    %46 = tpu.memref_slice %arg2[%45, %c0_i32_25] : memref<64x128xf32, #tpu.memory_space<any>> -> memref<1x128xf32, #tpu.memory_space<any>>
    %c6_i32_26 = arith.constant 6 : i32
    %c0_i32_27 = arith.constant 0 : i32
    %47 = tpu.memref_slice %arg6[%c6_i32_26, %c0_i32_27] : memref<8x128xf32, #tpu.memory_space<vmem>> -> memref<1x128xf32, #tpu.memory_space<vmem>>
    %48 = tpu.memref_slice %arg7[%c6_i32_24] : memref<8x!tpu.dma_semaphore, #tpu.memory_space<semaphore_mem>> -> memref<1x!tpu.dma_semaphore, #tpu.memory_space<semaphore_mem>>
    %49 = tpu.memref_squeeze %48 : memref<1x!tpu.dma_semaphore, #tpu.memory_space<semaphore_mem>> -> memref<!tpu.dma_semaphore, #tpu.memory_space<semaphore_mem>>
    tpu.enqueue_dma source(%46 : memref<1x128xf32, #tpu.memory_space<any>>) target(%47 : memref<1x128xf32, #tpu.memory_space<vmem>>) target_semaphore(%49 : memref<!tpu.dma_semaphore, #tpu.memory_space<semaphore_mem>>)
    %c7_i32 = arith.constant 7 : i32
    %50 = arith.addi %0, %c7_i32 : i32
    %51 = arith.index_cast %50 : i32 to index
    %52 = memref.load %arg1[%51] : memref<32xi32, #tpu.memory_space<smem>>
    %c7_i32_28 = arith.constant 7 : i32
    %c0_i32_29 = arith.constant 0 : i32
    %53 = tpu.memref_slice %arg2[%52, %c0_i32_29] : memref<64x128xf32, #tpu.memory_space<any>> -> memref<1x128xf32, #tpu.memory_space<any>>
    %c7_i32_30 = arith.constant 7 : i32
    %c0_i32_31 = arith.constant 0 : i32
    %54 = tpu.memref_slice %arg6[%c7_i32_30, %c0_i32_31] : memref<8x128xf32, #tpu.memory_space<vmem>> -> memref<1x128xf32, #tpu.memory_space<vmem>>
    %55 = tpu.memref_slice %arg7[%c7_i32_28] : memref<8x!tpu.dma_semaphore, #tpu.memory_space<semaphore_mem>> -> memref<1x!tpu.dma_semaphore, #tpu.memory_space<semaphore_mem>>
    %56 = tpu.memref_squeeze %55 : memref<1x!tpu.dma_semaphore, #tpu.memory_space<semaphore_mem>> -> memref<!tpu.dma_semaphore, #tpu.memory_space<semaphore_mem>>
    tpu.enqueue_dma source(%53 : memref<1x128xf32, #tpu.memory_space<any>>) target(%54 : memref<1x128xf32, #tpu.memory_space<vmem>>) target_semaphore(%56 : memref<!tpu.dma_semaphore, #tpu.memory_space<semaphore_mem>>)
    %c0_i32_32 = arith.constant 0 : i32
    %c0_i32_33 = arith.constant 0 : i32
    %c0_i32_34 = arith.constant 0 : i32
    %57 = tpu.memref_slice %arg2[%c0_i32_33, %c0_i32_34] : memref<64x128xf32, #tpu.memory_space<any>> -> memref<1x128xf32, #tpu.memory_space<any>>
    %c0_i32_35 = arith.constant 0 : i32
    %c0_i32_36 = arith.constant 0 : i32
    %58 = tpu.memref_slice %arg6[%c0_i32_35, %c0_i32_36] : memref<8x128xf32, #tpu.memory_space<vmem>> -> memref<1x128xf32, #tpu.memory_space<vmem>>
    %59 = tpu.memref_slice %arg7[%c0_i32_32] : memref<8x!tpu.dma_semaphore, #tpu.memory_space<semaphore_mem>> -> memref<1x!tpu.dma_semaphore, #tpu.memory_space<semaphore_mem>>
    %60 = tpu.memref_squeeze %59 : memref<1x!tpu.dma_semaphore, #tpu.memory_space<semaphore_mem>> -> memref<!tpu.dma_semaphore, #tpu.memory_space<semaphore_mem>>
    tpu.wait_dma2 semaphore(%60 : memref<!tpu.dma_semaphore, #tpu.memory_space<semaphore_mem>>) src(%57 : memref<1x128xf32, #tpu.memory_space<any>>) dst(%58 : memref<1x128xf32, #tpu.memory_space<vmem>>)
    %c1_i32_37 = arith.constant 1 : i32
    %c0_i32_38 = arith.constant 0 : i32
    %c0_i32_39 = arith.constant 0 : i32
    %61 = tpu.memref_slice %arg2[%c0_i32_38, %c0_i32_39] : memref<64x128xf32, #tpu.memory_space<any>> -> memref<1x128xf32, #tpu.memory_space<any>>
    %c1_i32_40 = arith.constant 1 : i32
    %c0_i32_41 = arith.constant 0 : i32
    %62 = tpu.memref_slice %arg6[%c1_i32_40, %c0_i32_41] : memref<8x128xf32, #tpu.memory_space<vmem>> -> memref<1x128xf32, #tpu.memory_space<vmem>>
    %63 = tpu.memref_slice %arg7[%c1_i32_37] : memref<8x!tpu.dma_semaphore, #tpu.memory_space<semaphore_mem>> -> memref<1x!tpu.dma_semaphore, #tpu.memory_space<semaphore_mem>>
    %64 = tpu.memref_squeeze %63 : memref<1x!tpu.dma_semaphore, #tpu.memory_space<semaphore_mem>> -> memref<!tpu.dma_semaphore, #tpu.memory_space<semaphore_mem>>
    tpu.wait_dma2 semaphore(%64 : memref<!tpu.dma_semaphore, #tpu.memory_space<semaphore_mem>>) src(%61 : memref<1x128xf32, #tpu.memory_space<any>>) dst(%62 : memref<1x128xf32, #tpu.memory_space<vmem>>)
    %c2_i32_42 = arith.constant 2 : i32
    %c0_i32_43 = arith.constant 0 : i32
    %c0_i32_44 = arith.constant 0 : i32
    %65 = tpu.memref_slice %arg2[%c0_i32_43, %c0_i32_44] : memref<64x128xf32, #tpu.memory_space<any>> -> memref<1x128xf32, #tpu.memory_space<any>>
    %c2_i32_45 = arith.constant 2 : i32
    %c0_i32_46 = arith.constant 0 : i32
    %66 = tpu.memref_slice %arg6[%c2_i32_45, %c0_i32_46] : memref<8x128xf32, #tpu.memory_space<vmem>> -> memref<1x128xf32, #tpu.memory_space<vmem>>
    %67 = tpu.memref_slice %arg7[%c2_i32_42] : memref<8x!tpu.dma_semaphore, #tpu.memory_space<semaphore_mem>> -> memref<1x!tpu.dma_semaphore, #tpu.memory_space<semaphore_mem>>
    %68 = tpu.memref_squeeze %67 : memref<1x!tpu.dma_semaphore, #tpu.memory_space<semaphore_mem>> -> memref<!tpu.dma_semaphore, #tpu.memory_space<semaphore_mem>>
    tpu.wait_dma2 semaphore(%68 : memref<!tpu.dma_semaphore, #tpu.memory_space<semaphore_mem>>) src(%65 : memref<1x128xf32, #tpu.memory_space<any>>) dst(%66 : memref<1x128xf32, #tpu.memory_space<vmem>>)
    %c3_i32_47 = arith.constant 3 : i32
    %c0_i32_48 = arith.constant 0 : i32
    %c0_i32_49 = arith.constant 0 : i32
    %69 = tpu.memref_slice %arg2[%c0_i32_48, %c0_i32_49] : memref<64x128xf32, #tpu.memory_space<any>> -> memref<1x128xf32, #tpu.memory_space<any>>
    %c3_i32_50 = arith.constant 3 : i32
    %c0_i32_51 = arith.constant 0 : i32
    %70 = tpu.memref_slice %arg6[%c3_i32_50, %c0_i32_51] : memref<8x128xf32, #tpu.memory_space<vmem>> -> memref<1x128xf32, #tpu.memory_space<vmem>>
    %71 = tpu.memref_slice %arg7[%c3_i32_47] : memref<8x!tpu.dma_semaphore, #tpu.memory_space<semaphore_mem>> -> memref<1x!tpu.dma_semaphore, #tpu.memory_space<semaphore_mem>>
    %72 = tpu.memref_squeeze %71 : memref<1x!tpu.dma_semaphore, #tpu.memory_space<semaphore_mem>> -> memref<!tpu.dma_semaphore, #tpu.memory_space<semaphore_mem>>
    tpu.wait_dma2 semaphore(%72 : memref<!tpu.dma_semaphore, #tpu.memory_space<semaphore_mem>>) src(%69 : memref<1x128xf32, #tpu.memory_space<any>>) dst(%70 : memref<1x128xf32, #tpu.memory_space<vmem>>)
    %c4_i32_52 = arith.constant 4 : i32
    %c0_i32_53 = arith.constant 0 : i32
    %c0_i32_54 = arith.constant 0 : i32
    %73 = tpu.memref_slice %arg2[%c0_i32_53, %c0_i32_54] : memref<64x128xf32, #tpu.memory_space<any>> -> memref<1x128xf32, #tpu.memory_space<any>>
    %c4_i32_55 = arith.constant 4 : i32
    %c0_i32_56 = arith.constant 0 : i32
    %74 = tpu.memref_slice %arg6[%c4_i32_55, %c0_i32_56] : memref<8x128xf32, #tpu.memory_space<vmem>> -> memref<1x128xf32, #tpu.memory_space<vmem>>
    %75 = tpu.memref_slice %arg7[%c4_i32_52] : memref<8x!tpu.dma_semaphore, #tpu.memory_space<semaphore_mem>> -> memref<1x!tpu.dma_semaphore, #tpu.memory_space<semaphore_mem>>
    %76 = tpu.memref_squeeze %75 : memref<1x!tpu.dma_semaphore, #tpu.memory_space<semaphore_mem>> -> memref<!tpu.dma_semaphore, #tpu.memory_space<semaphore_mem>>
    tpu.wait_dma2 semaphore(%76 : memref<!tpu.dma_semaphore, #tpu.memory_space<semaphore_mem>>) src(%73 : memref<1x128xf32, #tpu.memory_space<any>>) dst(%74 : memref<1x128xf32, #tpu.memory_space<vmem>>)
    %c5_i32_57 = arith.constant 5 : i32
    %c0_i32_58 = arith.constant 0 : i32
    %c0_i32_59 = arith.constant 0 : i32
    %77 = tpu.memref_slice %arg2[%c0_i32_58, %c0_i32_59] : memref<64x128xf32, #tpu.memory_space<any>> -> memref<1x128xf32, #tpu.memory_space<any>>
    %c5_i32_60 = arith.constant 5 : i32
    %c0_i32_61 = arith.constant 0 : i32
    %78 = tpu.memref_slice %arg6[%c5_i32_60, %c0_i32_61] : memref<8x128xf32, #tpu.memory_space<vmem>> -> memref<1x128xf32, #tpu.memory_space<vmem>>
    %79 = tpu.memref_slice %arg7[%c5_i32_57] : memref<8x!tpu.dma_semaphore, #tpu.memory_space<semaphore_mem>> -> memref<1x!tpu.dma_semaphore, #tpu.memory_space<semaphore_mem>>
    %80 = tpu.memref_squeeze %79 : memref<1x!tpu.dma_semaphore, #tpu.memory_space<semaphore_mem>> -> memref<!tpu.dma_semaphore, #tpu.memory_space<semaphore_mem>>
    tpu.wait_dma2 semaphore(%80 : memref<!tpu.dma_semaphore, #tpu.memory_space<semaphore_mem>>) src(%77 : memref<1x128xf32, #tpu.memory_space<any>>) dst(%78 : memref<1x128xf32, #tpu.memory_space<vmem>>)
    %c6_i32_62 = arith.constant 6 : i32
    %c0_i32_63 = arith.constant 0 : i32
    %c0_i32_64 = arith.constant 0 : i32
    %81 = tpu.memref_slice %arg2[%c0_i32_63, %c0_i32_64] : memref<64x128xf32, #tpu.memory_space<any>> -> memref<1x128xf32, #tpu.memory_space<any>>
    %c6_i32_65 = arith.constant 6 : i32
    %c0_i32_66 = arith.constant 0 : i32
    %82 = tpu.memref_slice %arg6[%c6_i32_65, %c0_i32_66] : memref<8x128xf32, #tpu.memory_space<vmem>> -> memref<1x128xf32, #tpu.memory_space<vmem>>
    %83 = tpu.memref_slice %arg7[%c6_i32_62] : memref<8x!tpu.dma_semaphore, #tpu.memory_space<semaphore_mem>> -> memref<1x!tpu.dma_semaphore, #tpu.memory_space<semaphore_mem>>
    %84 = tpu.memref_squeeze %83 : memref<1x!tpu.dma_semaphore, #tpu.memory_space<semaphore_mem>> -> memref<!tpu.dma_semaphore, #tpu.memory_space<semaphore_mem>>
    tpu.wait_dma2 semaphore(%84 : memref<!tpu.dma_semaphore, #tpu.memory_space<semaphore_mem>>) src(%81 : memref<1x128xf32, #tpu.memory_space<any>>) dst(%82 : memref<1x128xf32, #tpu.memory_space<vmem>>)
    %c7_i32_67 = arith.constant 7 : i32
    %c0_i32_68 = arith.constant 0 : i32
    %c0_i32_69 = arith.constant 0 : i32
    %85 = tpu.memref_slice %arg2[%c0_i32_68, %c0_i32_69] : memref<64x128xf32, #tpu.memory_space<any>> -> memref<1x128xf32, #tpu.memory_space<any>>
    %c7_i32_70 = arith.constant 7 : i32
    %c0_i32_71 = arith.constant 0 : i32
    %86 = tpu.memref_slice %arg6[%c7_i32_70, %c0_i32_71] : memref<8x128xf32, #tpu.memory_space<vmem>> -> memref<1x128xf32, #tpu.memory_space<vmem>>
    %87 = tpu.memref_slice %arg7[%c7_i32_67] : memref<8x!tpu.dma_semaphore, #tpu.memory_space<semaphore_mem>> -> memref<1x!tpu.dma_semaphore, #tpu.memory_space<semaphore_mem>>
    %88 = tpu.memref_squeeze %87 : memref<1x!tpu.dma_semaphore, #tpu.memory_space<semaphore_mem>> -> memref<!tpu.dma_semaphore, #tpu.memory_space<semaphore_mem>>
    tpu.wait_dma2 semaphore(%88 : memref<!tpu.dma_semaphore, #tpu.memory_space<semaphore_mem>>) src(%85 : memref<1x128xf32, #tpu.memory_space<any>>) dst(%86 : memref<1x128xf32, #tpu.memory_space<vmem>>)
    %c0 = arith.constant 0 : index
    %c0_72 = arith.constant 0 : index
    %89 = vector.load %arg6[%c0, %c0_72] : memref<8x128xf32, #tpu.memory_space<vmem>>, vector<8x128xf32>
    %c0_73 = arith.constant 0 : index
    %c0_74 = arith.constant 0 : index
    %90 = vector.load %arg3[%c0_73, %c0_74] : memref<128x128xf32, #tpu.memory_space<vmem>>, vector<128x128xf32>
    %cst = arith.constant dense<0.000000e+00> : vector<8x128xf32>
    %91 = tpu.matmul %89, %90, %cst {dimension_numbers = #tpu.dot_dimension_numbers<[1], [0], [0], [1], [0, 0, 1, 1], [], []>} : vector<8x128xf32>, vector<128x128xf32>, vector<8x128xf32> -> vector<8x128xf32>
    %c0_75 = arith.constant 0 : index
    %c0_76 = arith.constant 0 : index
    %92 = vector.load %arg4[%c0_75, %c0_76] : memref<1x128xf32, #tpu.memory_space<vmem>>, vector<1x128xf32>
    %93 = vector.broadcast %92 : vector<1x128xf32> to vector<8x128xf32>
    %94 = arith.addf %91, %93 : vector<8x128xf32>
    %95 = tpu.iota {dimensions = array<i32: 1>} : vector<8x128xi32>
    %c10_i32 = arith.constant 10 : i32
    %96 = vector.broadcast %c10_i32 : i32 to vector<8x128xi32>
    %97 = arith.cmpi slt, %95, %96 : vector<8x128xi32>
    %cst_77 = arith.constant -1.000000e+30 : f32
    %98 = vector.broadcast %cst_77 : f32 to vector<8x128xf32>
    %99 = arith.select %97, %94, %98 : vector<8x128xi1>, vector<8x128xf32>
    %cst_78 = arith.constant dense<0xFF800000> : vector<8xf32>
    %100 = vector.multi_reduction <maximumf>, %99, %cst_78 [1] : vector<8x128xf32> to vector<8xf32>
    %101 = vector.shape_cast %100 : vector<8xf32> to vector<8x1xf32>
    %102 = vector.broadcast %101 : vector<8x1xf32> to vector<8x128xf32>
    %103 = arith.subf %99, %102 : vector<8x128xf32>
    %104 = math.exp %103 : vector<8x128xf32>
    %cst_79 = arith.constant dense<0.000000e+00> : vector<8xf32>
    %105 = vector.multi_reduction <add>, %104, %cst_79 [1] : vector<8x128xf32> to vector<8xf32>
    %106 = vector.shape_cast %105 : vector<8xf32> to vector<8x1xf32>
    %107 = math.log %106 : vector<8x1xf32>
    %108 = vector.broadcast %107 : vector<8x1xf32> to vector<8x128xf32>
    %109 = arith.subf %103, %108 : vector<8x128xf32>
    %c0_80 = arith.constant 0 : index
    %c0_81 = arith.constant 0 : index
    %110 = vector.load %arg5[%c0_80, %c0_81] : memref<8x128xf32, #tpu.memory_space<vmem>>, vector<8x128xf32>
    tpu.vector_store %arg5[%c0_80, %c0_81], %109 {strides = array<i32>} : memref<8x128xf32, #tpu.memory_space<vmem>>, vector<8x128xf32>,
    return
  }
  func.func @transform_1(%arg0: i32, %arg1: memref<32xi32, #tpu.memory_space<smem>>) -> (i32, i32) {
    %c0_i32 = arith.constant 0 : i32
    %c0_i32_0 = arith.constant 0 : i32
    %c0_i32_1 = arith.constant 0 : i32
    return %c0_i32, %c0_i32_0 : i32, i32
  }
  func.func @transform_2(%arg0: i32, %arg1: memref<32xi32, #tpu.memory_space<smem>>) -> (i32, i32) {
    %c0_i32 = arith.constant 0 : i32
    %c0_i32_0 = arith.constant 0 : i32
    %c0_i32_1 = arith.constant 0 : i32
    return %c0_i32, %c0_i32_0 : i32, i32
  }
  func.func @transform_3(%arg0: i32, %arg1: memref<32xi32, #tpu.memory_space<smem>>) -> (i32, i32) {
    %c0_i32 = arith.constant 0 : i32
    %c0_i32_0 = arith.constant 0 : i32
    return %arg0, %c0_i32 : i32, i32
  }
}

</mosaic_0001>

<bundles_post_ra>
// kernel: tpu_custom_call.1
= control target key start
LH: loop header
LB: loop body
LE: loop exit
PB: predicated region body
PF: predicated region fallthrough
CT: control target
= control target key end

     0   :  { %s907_s18 = smov [#allocation5]   ;;  %s1144_s0 = inlined_call_operand.hbm [shape: s32[32], index: 0, kind: input, shape index: {}]   ;;  %s1145_s1 = inlined_call_operand.hbm [shape: f32[64,128], index: 1, kind: input, shape index: {}]   ;;  %s1146_s2 = inlined_call_operand.hbm [shape: f32[128,128], index: 2, kind: input, shape index: {}]   ;;  %s1147_s3 = inlined_call_operand.vmem [shape: f32[1,128], index: 3, kind: input, shape index: {}]   ;;  %s1148_s4 = inlined_call_operand.hbm [shape: f32[32,128], index: 4, kind: output, shape index: {}]  }
   0x1   :  { %1151 = sst [smem:[#allocation40_spill]] %s1146_s2  ;;  %s10_s17 = sshll.u32 %s1144_s0, 4  ;;  %s11_s17 = int_to_ptr.hbm [resolvable:$true] %s10_s17 }
   0x2   :  { %13 = dma.hbm_to_smem %s11_s17, 16, %s907_s18, [#allocation4] }
   0x3   :  { %865 = dma.done.wait [#allocation4], 16 }
   0x4   :  { %866 = vsyncadd [#allocation4], 4294967280 }
   0x5   :  { %16 = sfence }
   0x6   :  { %17 = vsyncpa [#allocation7], 0 }
   0x7   :  { %18 = vsyncpa [#allocation8], 0 }
   0x8   :  { %20 = vsyncpa [#allocation8 + $0x1], 0  ;;  %s947_s19 = smov 0   ;;  %s949_s20 = smov 0  }
   0x9   :  { %s951_s21 = smov 0   ;;  %s953_s22 = smov 0  }
   0xa LB: > { %s968_s0 = sadd.s32 4294967295, %s905_s22   ;;  %s502_s23 = sadd.s32 4294967294, %s905_s22   ;;  %s905_s22 = sphi %s953_s22, %s1162_s22   ;;  %s901_s21 = sphi %s951_s21, %s1161_s21   ;;  %s897_s20 = sphi %s949_s20, %s1160_s20   ;;  %s893_s19 = sphi %s947_s19, %s1159_s19  }
   0xb   : > { %s972_s24 = sadd.s32 1, %s905_s22   ;;  %s75_s25 = sadd.s32 1, %s901_s21 }
   0xc   : > { %s72_s26 = ssub.s32 %s905_s22, %s972_s24  ;;  %p85_p0 = scmp.ne.s32.totalorder %s901_s21, %s897_s20 }
   0xd   : > { %p73_p1 = scmp.eq.s32.totalorder %s72_s26, 0  ;;  %p86_p2 = scmp.eq.s32.totalorder %s968_s0, 3 }
   0xe   : > { %p91_p3 = scmp.ne.s32.totalorder %s897_s20, %s893_s19  ;;  %p92_p4 = scmp.eq.s32.totalorder %s502_s23, 3 }
   0xf   : > { %s983_s27 = scalar_select %p73_p1, %s901_s21, %s75_s25  }
  0x10   : > { %p985_p5 = por %p86_p2, %p85_p0  ;;  %p989_p6 = por %p92_p4, %p91_p3 }
  0x11   : > { %p503_p7 = scmp.ge.s32.totalorder %s905_s22, 1  ;;  %p99_p8 = scmp.lt.s32.totalorder %s905_s22, 5 }
  0x12   : > { %p535_p9 = scmp.eq.s32.totalorder %s968_s0, 0  ;;  %s1154_s2 = sld [smem:[#allocation40_spill]] }
  0x13   : > { %p100_p10 = pnand %p503_p7, %p99_p8  ;;  %s908_s7 = smov [#allocation6]  }
  0x14   : > { %s112_s8 = sshll.u32 %s908_s7, 4  ;;  %s909_s9 = smov 128   ;;  %s113_s8 = int_to_ptr.vmem [resolvable:$true] %s112_s8 }
  0x15   : > { %p527_p11 = pneg %p100_p10  ;;  %s910_s10 = smov 8  }
  0x16   : > { %131 = sbr.rel (%p100_p10) target bundleno = 572 (0x23c), region = 28 }
  0x17   : > { %p528_p12 = pnand %p535_p9, %p527_p11 }
  0x18   : > { %s110_s6 = sshll.u32 %s1154_s2, 4  ;;  %s111_s6 = int_to_ptr.hbm [resolvable:$true] %s110_s6 }
  0x19   : > { %530 = dma.hbm_to_vmem [thread:$0]  (!%p528_p12), %s111_s6, 2048, %s113_s8, [#allocation7], %s909_s9, %s909_s9, %s910_s10  }
  0x1b   : > { %868 = dma.done.wait (%p535_p9), [#allocation7], 2048  }
  0x1c   : > { %870 = vsyncadd (%p535_p9), [#allocation7], 4294965248  ;;  %s1149_s11 = sand.u32 1, %s897_s20   ;;  %s1007_s12 = sshll.u32 %s968_s0, 3 }
  0x1d   : > { %s1011_s13 = sshll.u32 %s1149_s11, 3  ;;  %s150_s14 = sld [smem:[#allocation5 + %s1007_s12]] }
  0x1e   : > { %s911_s15 = smov [#allocation2]   ;;  %s165_s17 = sadd.s32 1, %s1007_s12 }
  0x1f   : > { %s161_s16 = sshll.u32 %s911_s15, 4  ;;  %s166_s18 = sld [smem:[#allocation5 + %s165_s17]]  ;;  %s162_s16 = int_to_ptr.vmem [resolvable:$true] %s161_s16 }
  0x20   : > { %s183_s23 = sadd.s32 2, %s1007_s12  ;;  %s912_s25 = smov [#allocation2 + $0x1]  }
  0x21   : > { %s1016_s26 = sshll.u32 %s912_s25, 4  ;;  %s184_s30 = sld [smem:[#allocation5 + %s183_s23]]  ;;  %s180_s26 = int_to_ptr.vmem [resolvable:$true] %s1016_s26 }
  0x22   : > { %s913_s8 = smov [#allocation2 + $0x2]   ;;  %s1027_s25 = scalar_lea.hbm %s1145_s1, 64 }
  0x23   : > { %s151_s6 = scalar_lea.hbm %s1145_s1, %s150_s14  ;;  %s1022_s9 = sshll.u32 %s913_s8, 4  ;;  %s198_s9 = int_to_ptr.vmem [resolvable:$true] %s1022_s9 }
  0x24   : > { %s159_s7 = sshll.u32 %s151_s6, 4  ;;  %s160_s7 = int_to_ptr.hbm [resolvable:$true] %s159_s7 }
  0x25   : > { %s629_s10 = sshra.s32 %s160_s7, 4  ;;  %s630_s10 = int_to_ptr.hbm [resolvable:$true] %s629_s10 }
  0x26   : > { %s631_s15 = scalar_lea.hbm %s630_s10, 1  ;;  %p634_p0 = scmp.lt.s32.totalorder %s630_s10, %s1145_s1 }
  0x27   : > { %p632_p13 = scmp.ne.s32.totalorder %s630_s10, %s631_s15  ;;  %p635_p1 = scmp.lt.s32.totalorder %s1027_s25, %s631_s15 }
  0x29   : > { %p636_p2 = por %p635_p1, %p634_p0 }
  0x2b   : > { %p637_p3 = pnand %p636_p2, %p632_p13 }
  0x2d   : > { %640 = shalt.err (!%p637_p3)  }
  0x2e   : > { %164 = dma.hbm_to_vmem [thread:$0]  %s160_s7, 16, %s162_s16, [#allocation3] }
  0x2f   : > { %s167_s5 = scalar_lea.hbm %s1145_s1, %s166_s18  ;;  %s185_s17 = scalar_lea.hbm %s1145_s1, %s184_s30 }
  0x30   : > { %s177_s11 = sshll.u32 %s167_s5, 4  ;;  %s195_s2 = sshll.u32 %s185_s17, 4  ;;  %s178_s11 = int_to_ptr.hbm [resolvable:$true] %s177_s11  ;;  %s196_s2 = int_to_ptr.hbm [resolvable:$true] %s195_s2 }
  0x31   : > { %s653_s10 = sshra.s32 %s178_s11, 4  ;;  %s654_s10 = int_to_ptr.hbm [resolvable:$true] %s653_s10 }
  0x32   : > { %s655_s15 = scalar_lea.hbm %s654_s10, 1  ;;  %p658_p7 = scmp.lt.s32.totalorder %s654_s10, %s1145_s1 }
  0x33   : > { %p656_p4 = scmp.ne.s32.totalorder %s654_s10, %s655_s15  ;;  %p659_p8 = scmp.lt.s32.totalorder %s1027_s25, %s655_s15 }
  0x35   : > { %p660_p9 = por %p659_p8, %p658_p7 }
  0x37   : > { %p661_p10 = pnand %p660_p9, %p656_p4 }
  0x39   : > { %664 = shalt.err (!%p661_p10)  }
  0x3a   : > { %182 = dma.hbm_to_vmem [thread:$0]  %s178_s11, 16, %s180_s26, [#allocation3 + $0x1] }
  0x3b   : > { %s201_s18 = sadd.s32 3, %s1007_s12  ;;  %s677_s30 = sshra.s32 %s196_s2, 4  ;;  %s678_s30 = int_to_ptr.hbm [resolvable:$true] %s677_s30 }
  0x3c   : > { %s679_s7 = scalar_lea.hbm %s678_s30, 1  ;;  %p682_p12 = scmp.lt.s32.totalorder %s678_s30, %s1145_s1 }
  0x3d   : > { %p680_p11 = scmp.ne.s32.totalorder %s678_s30, %s679_s7  ;;  %p683_p13 = scmp.lt.s32.totalorder %s1027_s25, %s679_s7 }
  0x3f   : > { %p684_p0 = por %p683_p13, %p682_p12 }
  0x41   : > { %p685_p1 = pnand %p684_p0, %p680_p11 }
  0x43   : > { %688 = shalt.err (!%p685_p1)  }
  0x44   : > { %200 = dma.hbm_to_vmem [thread:$0]  %s196_s2, 16, %s198_s9, [#allocation3 + $0x2] }
  0x45   : > { %s202_s5 = sld [smem:[#allocation5 + %s201_s18]]  ;;  %s914_s6 = smov [#allocation2 + $0x3]  }
  0x46   : > { %s215_s26 = sshll.u32 %s914_s6, 4  ;;  %s219_s11 = sadd.s32 4, %s1007_s12  ;;  %s216_s26 = int_to_ptr.vmem [resolvable:$true] %s215_s26 }
  0x47   : > { %s220_s8 = sld [smem:[#allocation5 + %s219_s11]]  ;;  %s237_s17 = sadd.s32 5, %s1007_s12 }
  0x48   : > { %s915_s10 = smov [#allocation2 + $0x4]   ;;  %s238_s23 = sld [smem:[#allocation5 + %s237_s17]] }
  0x49   : > { %s1053_s15 = sshll.u32 %s915_s10, 4  ;;  %s916_s2 = smov [#allocation2 + $0x5]  }
  0x4a   : > { %1155 = sst [smem:[#allocation39_spill]] %s1053_s15  ;;  %s1059_s7 = sshll.u32 %s916_s2, 4  ;;  %s252_s7 = int_to_ptr.vmem [resolvable:$true] %s1059_s7 }
  0x4b   : > { %s203_s9 = scalar_lea.hbm %s1145_s1, %s202_s5 }
  0x4c   : > { %s213_s18 = sshll.u32 %s203_s9, 4  ;;  %s214_s18 = int_to_ptr.hbm [resolvable:$true] %s213_s18 }
  0x4d   : > { %s221_s6 = scalar_lea.hbm %s1145_s1, %s220_s8  ;;  %s701_s11 = sshra.s32 %s214_s18, 4  ;;  %s702_s11 = int_to_ptr.hbm [resolvable:$true] %s701_s11 }
  0x4e   : > { %s703_s10 = scalar_lea.hbm %s702_s11, 1  ;;  %p706_p3 = scmp.lt.s32.totalorder %s702_s11, %s1145_s1 }
  0x4f   : > { %p704_p2 = scmp.ne.s32.totalorder %s702_s11, %s703_s10  ;;  %p707_p4 = scmp.lt.s32.totalorder %s1027_s25, %s703_s10 }
  0x51   : > { %p708_p7 = por %p707_p4, %p706_p3 }
  0x53   : > { %p709_p8 = pnand %p708_p7, %p704_p2 }
  0x55   : > { %712 = shalt.err (!%p709_p8)  }
  0x56   : > { %218 = dma.hbm_to_vmem [thread:$0]  %s214_s18, 16, %s216_s26, [#allocation3 + $0x3] }
  0x57   : > { %s231_s5 = sshll.u32 %s221_s6, 4  ;;  %s239_s9 = scalar_lea.hbm %s1145_s1, %s238_s23  ;;  %s232_s5 = int_to_ptr.hbm [resolvable:$true] %s231_s5 }
  0x58   : > { %s249_s8 = sshll.u32 %s239_s9, 4  ;;  %s725_s2 = sshra.s32 %s232_s5, 4  ;;  %s726_s2 = int_to_ptr.hbm [resolvable:$true] %s725_s2  ;;  %s250_s8 = int_to_ptr.hbm [resolvable:$true] %s249_s8 }
  0x59   : > { %s727_s14 = scalar_lea.hbm %s726_s2, 1  ;;  %p730_p10 = scmp.lt.s32.totalorder %s726_s2, %s1145_s1 }
  0x5a   : > { %p728_p9 = scmp.ne.s32.totalorder %s726_s2, %s727_s14  ;;  %p731_p11 = scmp.lt.s32.totalorder %s1027_s25, %s727_s14 }
  0x5c   : > { %p732_p12 = por %p731_p11, %p730_p10 }
  0x5e   : > { %p733_p13 = pnand %p732_p12, %p728_p9 }
  0x60   : > { %736 = shalt.err (!%p733_p13)  }
  0x61   : > { %s1156_s26 = sld [smem:[#allocation39_spill]]  ;;  %s255_s23 = sadd.s32 6, %s1007_s12 }
  0x62   : > { %s749_s6 = sshra.s32 %s250_s8, 4  ;;  %s750_s6 = int_to_ptr.hbm [resolvable:$true] %s749_s6 }
  0x63   : > { %s751_s11 = scalar_lea.hbm %s750_s6, 1  ;;  %p754_p1 = scmp.lt.s32.totalorder %s750_s6, %s1145_s1 }
  0x64   : > { %p752_p0 = scmp.ne.s32.totalorder %s750_s6, %s751_s11  ;;  %p755_p2 = scmp.lt.s32.totalorder %s1027_s25, %s751_s11 }
  0x66   : > { %p756_p3 = por %p755_p2, %p754_p1 }
  0x67   : > { %s1157_s18 = int_to_ptr.vmem [resolvable:$true] %s1156_s26 }
  0x68   : > { %236 = dma.hbm_to_vmem [thread:$0]  %s232_s5, 16, %s1157_s18, [#allocation3 + $0x4] }
  0x69   : > { %p757_p4 = pnand %p756_p3, %p752_p0 }
  0x6b   : > { %760 = shalt.err (!%p757_p4)  }
  0x6c   : > { %254 = dma.hbm_to_vmem [thread:$0]  %s250_s8, 16, %s252_s7, [#allocation3 + $0x5] }
  0x6d   : > { %s256_s16 = sld [smem:[#allocation5 + %s255_s23]]  ;;  %s273_s5 = sadd.s32 7, %s1007_s12 }
  0x6e   : > { %s274_s30 = sld [smem:[#allocation5 + %s273_s5]]  ;;  %s917_s9 = smov [#allocation2 + $0x6]  }
  0x6f   : > { %s269_s2 = sshll.u32 %s917_s9, 4  ;;  %s918_s14 = smov [#allocation2 + $0x7]   ;;  %s270_s2 = int_to_ptr.vmem [resolvable:$true] %s269_s2 }
  0x70   : > { %s1086_s0 = sshll.u32 %s918_s14, 4  ;;  %s288_s0 = int_to_ptr.vmem [resolvable:$true] %s1086_s0 }
  0x73   : > { %s257_s18 = scalar_lea.hbm %s1145_s1, %s256_s16 }
  0x74   : > { %s267_s6 = sshll.u32 %s257_s18, 4  ;;  %s275_s8 = scalar_lea.hbm %s1145_s1, %s274_s30  ;;  %s268_s6 = int_to_ptr.hbm [resolvable:$true] %s267_s6 }
  0x75   : > { %s773_s23 = sshra.s32 %s268_s6, 4  ;;  %s774_s23 = int_to_ptr.hbm [resolvable:$true] %s773_s23 }
  0x76   : > { %s775_s10 = scalar_lea.hbm %s774_s23, 1  ;;  %p778_p8 = scmp.lt.s32.totalorder %s774_s23, %s1145_s1 }
  0x77   : > { %p776_p7 = scmp.ne.s32.totalorder %s774_s23, %s775_s10  ;;  %p779_p9 = scmp.lt.s32.totalorder %s1027_s25, %s775_s10 }
  0x79   : > { %p780_p10 = por %p779_p9, %p778_p8 }
  0x7b   : > { %p781_p11 = pnand %p780_p10, %p776_p7 }
  0x7d   : > { %784 = shalt.err (!%p781_p11)  }
  0x7e   : > { %272 = dma.hbm_to_vmem [thread:$0]  %s268_s6, 16, %s270_s2, [#allocation3 + $0x6] }
  0x7f   : > { %s285_s16 = sshll.u32 %s275_s8, 4  ;;  %s286_s16 = int_to_ptr.hbm [resolvable:$true] %s285_s16 }
  0x80   : > { %s797_s9 = sshra.s32 %s286_s16, 4  ;;  %s798_s9 = int_to_ptr.hbm [resolvable:$true] %s797_s9 }
  0x81   : > { %s799_s14 = scalar_lea.hbm %s798_s9, 1  ;;  %p802_p13 = scmp.lt.s32.totalorder %s798_s9, %s1145_s1 }
  0x82   : > { %p800_p12 = scmp.ne.s32.totalorder %s798_s9, %s799_s14  ;;  %p803_p0 = scmp.lt.s32.totalorder %s1027_s25, %s799_s14 }
  0x84   : > { %p804_p1 = por %p803_p0, %p802_p13 }
  0x86   : > { %p805_p2 = pnand %p804_p1, %p800_p12 }
  0x88   : > { %808 = shalt.err (!%p805_p2)  }
  0x89   : > { %290 = dma.hbm_to_vmem [thread:$0]  %s286_s16, 16, %s288_s0, [#allocation3 + $0x7] }
  0x8a   : > { %s148_s26 = scalar_lea.vmem [#allocation9], %s1011_s13 }
  0x8b   : > { %871 = dma.done.wait [#allocation3], 16 }
  0x8c   : > { %872 = vsyncadd [#allocation3], 4294967280 }
  0x8d   : > { %873 = dma.done.wait [#allocation3 + $0x1], 16 }
  0x8e   : > { %874 = vsyncadd [#allocation3 + $0x1], 4294967280 }
  0x8f   : > { %875 = dma.done.wait [#allocation3 + $0x2], 16 }
  0x90   : > { %876 = vsyncadd [#allocation3 + $0x2], 4294967280 }
  0x91   : > { %877 = dma.done.wait [#allocation3 + $0x3], 16 }
  0x92   : > { %878 = vsyncadd [#allocation3 + $0x3], 4294967280 }
  0x93   : > { %879 = dma.done.wait [#allocation3 + $0x4], 16 }
  0x94   : > { %880 = vsyncadd [#allocation3 + $0x4], 4294967280 }
  0x95   : > { %881 = dma.done.wait [#allocation3 + $0x5], 16 }
  0x96   : > { %882 = vsyncadd [#allocation3 + $0x5], 4294967280 }
  0x97   : > { %883 = dma.done.wait [#allocation3 + $0x6], 16 }
  0x98   : > { %884 = vsyncadd [#allocation3 + $0x6], 4294967280 }
  0x99   : > { %885 = dma.done.wait [#allocation3 + $0x7], 16 }
  0x9a   : > { %886 = vsyncadd [#allocation3 + $0x7], 4294967280  ;;  %v324_v0 = vld [vmem:[#allocation6 + $0x78] sm:$0xff]  ;;  %v323_v1 = vld [vmem:[#allocation6 + $0x70] sm:$0xff]  ;;  %v349_v17 = vlaneseq  ;;  %s375_s6 = scalar_lea.hbm %s1148_s4, %s1007_s12  ;;  %s377_s11 = sshll.u32 %s148_s26, 4  ;;  %s378_s11 = int_to_ptr.vmem [resolvable:$true] %s377_s11 }
  0x9b   : > { %329 = vmatpush.msra.mxu0 %v324_v0  ;;  %v322_v2 = vld [vmem:[#allocation6 + $0x68] sm:$0xff]  ;;  %v321_v3 = vld [vmem:[#allocation6 + $0x60] sm:$0xff]  ;;  %v320_v4 = vld [vmem:[#allocation6 + $0x58] sm:$0xff]  ;;  %s379_s7 = sshll.u32 %s375_s6, 4  ;;  %s1158_s8 = sand.u32 1, %s897_s20   ;;  %s380_s7 = int_to_ptr.hbm [resolvable:$true] %s379_s7 }
  0x9c   : > { %v319_v5 = vld [vmem:[#allocation6 + $0x50] sm:$0xff]  ;;  %v318_v6 = vld [vmem:[#allocation6 + $0x48] sm:$0xff]  ;;  %v317_v7 = vld [vmem:[#allocation6 + $0x40] sm:$0xff]  ;;  %v350_v18 = vand.u32 127, %v349_v17  ;;  %s365_s23 = scalar_lea.sflag [#allocation8], %s1158_s8  ;;  %s835_s10 = sshra.s32 %s380_s7, 4  ;;  %s836_s10 = int_to_ptr.hbm [resolvable:$true] %s835_s10 }
  0x9d   : > { %330 = vmatpush.msra.mxu0 %v323_v1  ;;  %v316_v8 = vld [vmem:[#allocation6 + $0x38] sm:$0xff]  ;;  %v315_v9 = vld [vmem:[#allocation6 + $0x30] sm:$0xff]  ;;  %v314_v10 = vld [vmem:[#allocation6 + $0x28] sm:$0xff]  ;;  %s837_s17 = scalar_lea.hbm %s836_s10, 8  ;;  %s841_s16 = scalar_lea.hbm %s1148_s4, 32 }
  0x9e   : > { %v313_v11 = vld [vmem:[#allocation6 + $0x20] sm:$0xff]  ;;  %v312_v12 = vld [vmem:[#allocation6 + $0x18] sm:$0xff]  ;;  %v311_v13 = vld [vmem:[#allocation6 + $0x10] sm:$0xff]  ;;  %vm351_vm0 = vcmp.lt.s32.totalorder %v350_v18, 10  ;;  %p838_p3 = scmp.ne.s32.totalorder %s836_s10, %s837_s17  ;;  %p842_p8 = scmp.lt.s32.totalorder %s836_s10, %s1148_s4 }
  0x9f   : > { %331 = vmatpush.msra.mxu0 %v322_v2  ;;  %v310_v14 = vld [vmem:[#allocation6 + $0x8] sm:$0xff]  ;;  %v309_v15 = vld [vmem:[#allocation6] sm:$0xff]  ;;  %v308_v16 = vld [vmem:[#allocation2] sm:$0xff]  ;;  %p843_p9 = scmp.lt.s32.totalorder %s841_s16, %s837_s17 }
  0xa0   : > { %v582_v19 = vld [vmem:[%s1147_s3] ss:$0 sm:$0xff]  ;;  %p839_p4 = pnand %p838_p3, %p985_p5 }
  0xa1   : > { %332 = vmatpush.msra.mxu0 %v321_v3  ;;  %p844_p10 = por %p843_p9, %p842_p8 }
  0xa2   : > { %p840_p7 = pneg %p839_p4 }
  0xa3   : > { %333 = vmatpush.msra.mxu0 %v320_v4 }
  0xa4   : > { %p845_p11 = pnand %p844_p10, %p840_p7 }
  0xa5   : > { %334 = vmatpush.msra.mxu0 %v319_v5 }
  0xa7   : > { %335 = vmatpush.msra.mxu0 %v318_v6 }
  0xa9   : > { %336 = vmatpush.msra.mxu0 %v317_v7 }
  0xab   : > { %337 = vmatpush.msra.mxu0 %v316_v8 }
  0xad   : > { %338 = vmatpush.msra.mxu0 %v315_v9 }
  0xaf   : > { %339 = vmatpush.msra.mxu0 %v314_v10 }
  0xb1   : > { %340 = vmatpush.msra.mxu0 %v313_v11 }
  0xb3   : > { %341 = vmatpush.msra.mxu0 %v312_v12 }
  0xb5   : > { %342 = vmatpush.msra.mxu0 %v311_v13 }
  0xb7   : > { %343 = vmatpush.msra.mxu0 %v310_v14 }
  0xb9   : > { %344 = vmatpush.msra.mxu0 %v309_v15 }
  0xba   : > { %345 = vmatmul.f32.vlgmr.msra.gmra.mxu0 %v308_v16 }
 0x137   : > { %v346_v20 = vpop.f32.mrf.mxu0 }
 0x138   : > { %v347_v21 = vadd.f32 %v582_v19, %v346_v20 }
 0x13a   : > { %v352_v22 = vsel %vm351_vm0, %v347_v21, -1e+30 }
 0x13b   : > { %353 = vmax.xlane.f32.xlu0 %v352_v22 }
 0x1ae   : > { %v354_v23 = vpop.xlane.xlu0 %353 }
 0x1af   : > { %v355_v24 = vsub.f32 %v352_v22, %v354_v23 }
 0x1b1   : > { %v356_v25 = vmul.f32 1.442695, %v355_v24 }
 0x1b3   : > { %583 = vpow2.f32 %v356_v25 }
 0x1b9   : > { %v584_v26 = vpop.eup %583 }
 0x1ba   : > { %358 = vadd.xlane.f32.xlu0 %v584_v26 }
 0x22d   : > { %v359_v27 = vpop.xlane.xlu0 %358 }
 0x22e   : > { %585 = vlog2.f32 %v359_v27 }
 0x234   : > { %v586_v28 = vpop.eup %585 }
 0x235   : > { %v361_v29 = vmul.f32 0.6931472, %v586_v28 }
 0x237   : > { %v362_v30 = vsub.f32 %v355_v24, %v361_v29 }
 0x239   : > { %363 = vst [vmem:[%s148_s26] sm:$0xff] %v362_v30 }
 0x23a   : > { %848 = shalt.err (!%p845_p11)
}
 0x23b   : > { %525 = dma.vmem_to_hbm [thread:$0]  (%p985_p5), %s378_s11, 128, %s380_s7, %s365_s23  }
 0x23c PF: > { %p537_p12 = scmp.ge.s32.totalorder %s905_s22, 2  ;;  %s391_s13 = sand.u32 1, %s893_s19  }
 0x23d   : > { %s392_s30 = scalar_lea.sflag [#allocation8], %s391_s13 }
 0x23e   : > { %p532_p13 = pnand %p537_p12, %p989_p6 }
 0x240   : > { %p533_p0 = pneg %p532_p13 }
 0x242   : > { %888 = dma.done.wait (%p533_p0), %s392_s30, 128  }
 0x243   : > { %890 = vsyncadd (%p533_p0), %s392_s30, 4294967168  ;;  %p23_p1 = scmp.ge.s32.totalorder %s972_s24, 6   ;;  %s1159_s19 = smov %s897_s20 }
 0x244   : > { %s1160_s20 = smov %s901_s21  ;;  %s1161_s21 = smov %s983_s27 }
 0x245   : > { %s1162_s22 = smov %s972_s24  ;;  %25 = sbr.rel (!%p23_p1) target bundleno = 10 (0xa), region = 126 }
 0x24a   :  { %398 = vsyncpa [#allocation7], 1 }
 0x24b   :  { %400 = vsyncpa [#allocation7 + $0x1], 1 }
 0x24c   :  { %401 = vsyncpa [#allocation8], 1 }
 0x24d   :  { %403 = vsyncpa [#allocation8 + $0x1], 1 }
 0x24e   :  { %404 = vsyncmov [#allocation3] }
 0x251   :  { %s405_s22 = vpop.sfrf %404 }
 0x252   :  { %p513_p5 = scmp.ne.s32.totalorder %s405_s22, 0 }
 0x254   :  { %409 = shalt.err (%p513_p5)  }
 0x255   :  { %411 = vsyncmov [#allocation3 + $0x1] }
 0x258   :  { %s412_s28 = vpop.sfrf %411 }
 0x259   :  { %p514_p6 = scmp.ne.s32.totalorder %s412_s28, 0 }
 0x25b   :  { %416 = shalt.err (%p514_p6)  }
 0x25c   :  { %418 = vsyncmov [#allocation3 + $0x2] }
 0x25f   :  { %s419_s29 = vpop.sfrf %418 }
 0x260   :  { %p515_p2 = scmp.ne.s32.totalorder %s419_s29, 0 }
 0x262   :  { %423 = shalt.err (%p515_p2)  }
 0x263   :  { %425 = vsyncmov [#allocation3 + $0x3] }
 0x266   :  { %s426_s27 = vpop.sfrf %425 }
 0x267   :  { %p516_p3 = scmp.ne.s32.totalorder %s426_s27, 0 }
 0x269   :  { %430 = shalt.err (%p516_p3)  }
 0x26a   :  { %432 = vsyncmov [#allocation3 + $0x4] }
 0x26d   :  { %s433_s1 = vpop.sfrf %432 }
 0x26e   :  { %p517_p4 = scmp.ne.s32.totalorder %s433_s1, 0 }
 0x270   :  { %437 = shalt.err (%p517_p4)  }
 0x271   :  { %439 = vsyncmov [#allocation3 + $0x5] }
 0x274   :  { %s440_s3 = vpop.sfrf %439 }
 0x275   :  { %p518_p7 = scmp.ne.s32.totalorder %s440_s3, 0 }
 0x277   :  { %444 = shalt.err (%p518_p7)  }
 0x278   :  { %446 = vsyncmov [#allocation3 + $0x6] }
 0x27b   :  { %s447_s4 = vpop.sfrf %446 }
 0x27c   :  { %p519_p8 = scmp.ne.s32.totalorder %s447_s4, 0 }
 0x27e   :  { %451 = shalt.err (%p519_p8)  }
 0x27f   :  { %453 = vsyncmov [#allocation3 + $0x7] }
 0x282   :  { %s454_s19 = vpop.sfrf %453 }
 0x283   :  { %p520_p9 = scmp.ne.s32.totalorder %s454_s19, 0 }
 0x285   :  { %458 = shalt.err (%p520_p9)  }

</bundles_post_ra>
